<compile_context>
chip_gen: v5e
topology: v5e:2x2
jax: 0.10.0
libtpu: 0.0.40
codegen_flags: <defaults>
</compile_context>

<pallas_src>
import functools

import jax
import jax.numpy as jnp
from jax.experimental import pallas as pl
from jax.experimental.pallas import tpu as pltpu


def _round_up(x, m):
    return ((x + m - 1) // m) * m


# ----------------------------------------------------------------------------- kernel
def resmlp_kernel(x_ref, wr_ref, w1_ref, w2_ref, bias_ref, o_ref):
    """Fused ResMLP block. All BN scales/shifts and biases are pre-folded.

    x_ref    : [tile_n, d_in]        (compute dtype: f32 or bf16)
    wr_ref   : [d_in, d_out_p]       folded residual weight  (wr * so)
    w1_ref   : [d_in, d_out_p]       folded MLP#1 weight     (w1 * s1)
    w2_ref   : [d_out_p, d_out_p]    folded MLP#2 weight     (w2 * so)
    bias_ref : [2, d_out_p] f32      row0 = b1*s1 + sh1, row1 = (br + b2)*so + sho
    o_ref    : [tile_n, d_out_p] f32
    """
    x = x_ref[...]

    # main branch: Linear -> (folded BN) -> ReLU   (f32 accumulation + f32 epilogue)
    h = jnp.dot(x, w1_ref[...], preferred_element_type=jnp.float32)
    h = jnp.maximum(h + bias_ref[0:1, :], 0.0)

    # residual Linear + second Linear + folded output BN -> ReLU
    y = jnp.dot(x, wr_ref[...], preferred_element_type=jnp.float32)
    y = y + jnp.dot(h.astype(w2_ref.dtype), w2_ref[...],
                    preferred_element_type=jnp.float32)
    y = jnp.maximum(y + bias_ref[1:2, :], 0.0)

    o_ref[...] = y.astype(o_ref.dtype)


# ----------------------------------------------------------------------------- wrapper
def resmlp_forward(x, kp, *, max_tile_n=512):
    """x: [N, d_in] f32. kp: output of prepare_params(). Returns [N, d_out] f32."""
    N, d_in = x.shape
    d_out = kp["d_out"]
    d_out_p = kp["wr"].shape[1]
    cdt = kp["wr"].dtype
    itemsize = jnp.dtype(cdt).itemsize

    # Adaptive batch tile: large tiles amortize the ~0.35us/step pipeline overhead while
    # keeping the grid non-degenerate for small N. Pad N host-side to a tile multiple.
    tile_n = min(max_tile_n, _round_up(N, 8))
    n_pad = _round_up(N, tile_n)

    xk = x.astype(cdt)
    if n_pad != N:
        xk = jnp.pad(xk, ((0, n_pad - N), (0, 0)))

    grid = (n_pad // tile_n,)

    # Explicit VMEM budget: double-buffered x/out tiles + resident weights + headroom.
    tile_bytes = tile_n * d_in * itemsize + tile_n * d_out_p * 4
    weight_bytes = (2 * d_in * d_out_p + d_out_p * d_out_p) * itemsize + 2 * d_out_p * 4
    budget = 2 * 2 * tile_bytes + 2 * weight_bytes
    vmem_limit = int(min(max(2 * budget, 32 << 20), 56 << 20))  # stay under v7x 64 MiB

    in_specs = [
        pl.BlockSpec((tile_n, d_in), lambda i: (i, 0)),       # x: tiled over batch
        pl.BlockSpec((d_in, d_out_p), lambda i: (0, 0)),      # wr (folded, resident)
        pl.BlockSpec((d_in, d_out_p), lambda i: (0, 0)),      # w1 (folded, resident)
        pl.BlockSpec((d_out_p, d_out_p), lambda i: (0, 0)),   # w2 (folded, resident)
        pl.BlockSpec((2, d_out_p), lambda i: (0, 0)),         # packed biases (f32)
    ]
    out_spec = pl.BlockSpec((tile_n, d_out_p), lambda i: (i, 0))

    out = pl.pallas_call(
        resmlp_kernel,
        out_shape=jax.ShapeDtypeStruct((n_pad, d_out_p), jnp.float32),
        grid_spec=pltpu.PrefetchScalarGridSpec(
            num_scalar_prefetch=0,
            grid=grid,
            in_specs=in_specs,
            out_specs=out_spec,
        ),
        compiler_params=pltpu.CompilerParams(
            dimension_semantics=("parallel",),
            vmem_limit_bytes=vmem_limit,
        ),
    )(xk, kp["wr"], kp["w1"], kp["w2"], kp["bias"])

    return out[:N, :d_out]


# ----------------------------------------------------------------------------- params
def make_params(key, d_in, d_out):
    """Raw (unfolded) parameters, PyTorch-equivalent init; Linear weights stored [in, out].

    When d_in == d_out the residual path is nn.Identity(); represent it exactly as
    wr = I, br = 0 (identical math, same kernel).
    """
    ks = jax.random.split(key, 10)
    eps = 1e-5

    def lin_init(kw, kb, fan_in, shape_w, shape_b):
        bound = 1.0 / jnp.sqrt(fan_in)
        w = jax.random.uniform(kw, shape_w, jnp.float32, -bound, bound)
        b = jax.random.uniform(kb, shape_b, jnp.float32, -bound, bound)
        return w, b

    if d_in != d_out:
        wr, br = lin_init(ks[0], ks[1], d_in, (d_in, d_out), (1, d_out))
    else:
        wr, br = jnp.eye(d_in, dtype=jnp.float32), jnp.zeros((1, d_out), jnp.float32)
    w1, b1 = lin_init(ks[2], ks[3], d_in, (d_in, d_out), (1, d_out))
    w2, b2 = lin_init(ks[4], ks[5], d_out, (d_out, d_out), (1, d_out))

    # BatchNorm1d (eval): fold gamma/beta/running stats into per-feature scale/shift.
    def bn_fold(kg, kb):
        gamma = 1.0 + 0.1 * jax.random.normal(kg, (1, d_out), jnp.float32)
        beta = 0.1 * jax.random.normal(kb, (1, d_out), jnp.float32)
        running_mean = jnp.zeros((1, d_out), jnp.float32)
        running_var = jnp.ones((1, d_out), jnp.float32)
        scale = gamma / jnp.sqrt(running_var + eps)
        shift = beta - running_mean * scale
        return scale, shift

    s1, sh1 = bn_fold(ks[6], ks[7])
    so, sho = bn_fold(ks[8], ks[9])

    return dict(wr=wr, br=br, w1=w1, b1=b1, s1=s1, sh1=sh1,
                w2=w2, b2=b2, so=so, sho=sho)


def prepare_params(p, d_out, *, compute_dtype=jnp.float32, lane=128):
    """One-time constant folding + lane padding (NOT per forward call).

    w1' = w1*s1            b1' = b1*s1 + sh1
    wr' = wr*so            w2' = w2*so
    b_out' = (br + b2)*so + sho
    Output feature axis is zero-padded to a multiple of 128 lanes (padded features
    stay exactly 0 through ReLU and are sliced off after the kernel).
    """
    d_out_p = _round_up(d_out, lane)
    pad_c = functools.partial(jnp.pad, pad_width=((0, 0), (0, d_out_p - d_out)))

    w1f = p["w1"] * p["s1"]
    b1f = p["b1"] * p["s1"] + p["sh1"]
    wrf = p["wr"] * p["so"]
    w2f = p["w2"] * p["so"]
    bof = (p["br"] + p["b2"]) * p["so"] + p["sho"]

    w1p = pad_c(w1f)
    wrp = pad_c(wrf)
    w2p = jnp.pad(w2f, ((0, d_out_p - d_out), (0, d_out_p - d_out)))
    bias = jnp.concatenate([pad_c(b1f), pad_c(bof)], axis=0)   # [2, d_out_p]

    return dict(
        wr=wrp.astype(compute_dtype),
        w1=w1p.astype(compute_dtype),
        w2=w2p.astype(compute_dtype),
        bias=bias.astype(jnp.float32),   # epilogue stays f32 (v5e-safe)
        d_out=d_out,
    )


# ----------------------------------------------------------------------------- reference
def resmlp_reference(x, p):
    res = x @ p["wr"] + p["br"]
    h = x @ p["w1"] + p["b1"]
    h = jnp.maximum(h * p["s1"] + p["sh1"], 0.0)
    h = h @ p["w2"] + p["b2"]
    y = res + h
    y = jnp.maximum(y * p["so"] + p["sho"], 0.0)
    return y


if __name__ == "__main__":
    N, d_in, d_out = 16, 16, 32
    key = jax.random.PRNGKey(0)
    kx, kparams = jax.random.split(key)
    x = jax.random.normal(kx, (N, d_in), jnp.float32)
    params = make_params(kparams, d_in, d_out)
    ref = resmlp_reference(x, params)

    # f32 operand path: matches the f32 reference to tight tolerance.
    kp_f32 = prepare_params(params, d_out, compute_dtype=jnp.float32)
    out_f32 = jax.block_until_ready(resmlp_forward(x, kp_f32))
    assert out_f32.shape == (N, d_out)
    assert jnp.allclose(out_f32, ref, atol=1e-5, rtol=1e-5)

    # bf16 operand path (MXU-friendly on v6e/v7x); f32 accumulation + f32 epilogue.
    kp_bf16 = prepare_params(params, d_out, compute_dtype=jnp.bfloat16)
    out_bf16 = jax.block_until_ready(resmlp_forward(x, kp_bf16))
    assert out_bf16.shape == (N, d_out)
    assert jnp.allclose(out_bf16, ref, atol=1e-1, rtol=1e-1)

    print("KERNEL_OK")
</pallas_src>

<mosaic_0001>
module attributes {stable_mosaic.version = 11 : i64} {
  func.func @resmlp_kernel(%arg0: i32, %arg1: memref<16x16xf32, #tpu.memory_space<vmem>>, %arg2: memref<16x128xf32, #tpu.memory_space<vmem>>, %arg3: memref<16x128xf32, #tpu.memory_space<vmem>>, %arg4: memref<128x128xf32, #tpu.memory_space<vmem>>, %arg5: memref<2x128xf32, #tpu.memory_space<vmem>>, %arg6: memref<16x128xf32, #tpu.memory_space<vmem>>) attributes {dimension_semantics = [#tpu.dimension_semantics<parallel>], iteration_bounds = array<i64: 1>, scalar_prefetch = 0 : i64, scratch_operands = 0 : i64, tpu.core_type = #tpu.core_type<tc>, window_params = [{transform_indices = @transform_0, window_bounds = array<i64: 16, 16>}, {pipeline_mode = #tpu.pipeline_mode<synchronous>, transform_indices = @transform_1, window_bounds = array<i64: 16, 128>}, {pipeline_mode = #tpu.pipeline_mode<synchronous>, transform_indices = @transform_2, window_bounds = array<i64: 16, 128>}, {pipeline_mode = #tpu.pipeline_mode<synchronous>, transform_indices = @transform_3, window_bounds = array<i64: 128, 128>}, {pipeline_mode = #tpu.pipeline_mode<synchronous>, transform_indices = @transform_4, window_bounds = array<i64: 2, 128>}, {transform_indices = @transform_5, window_bounds = array<i64: 16, 128>}]} {
    %c0 = arith.constant 0 : index
    %c0_0 = arith.constant 0 : index
    %0 = vector.load %arg1[%c0, %c0_0] : memref<16x16xf32, #tpu.memory_space<vmem>>, vector<16x16xf32>
    %c0_1 = arith.constant 0 : index
    %c0_2 = arith.constant 0 : index
    %1 = vector.load %arg3[%c0_1, %c0_2] : memref<16x128xf32, #tpu.memory_space<vmem>>, vector<16x128xf32>
    %cst = arith.constant dense<0.000000e+00> : vector<16x128xf32>
    %2 = tpu.matmul %0, %1, %cst {dimension_numbers = #tpu.dot_dimension_numbers<[1], [0], [0], [1], [0, 0, 1, 1], [], []>} : vector<16x16xf32>, vector<16x128xf32>, vector<16x128xf32> -> vector<16x128xf32>
    %c0_3 = arith.constant 0 : index
    %c0_4 = arith.constant 0 : index
    %3 = vector.load %arg5[%c0_3, %c0_4] : memref<2x128xf32, #tpu.memory_space<vmem>>, vector<1x128xf32>
    %4 = vector.broadcast %3 : vector<1x128xf32> to vector<16x128xf32>
    %5 = arith.addf %2, %4 : vector<16x128xf32>
    %cst_5 = arith.constant 0.000000e+00 : f32
    %6 = vector.broadcast %cst_5 : f32 to vector<16x128xf32>
    %7 = arith.maximumf %5, %6 : vector<16x128xf32>
    %c0_6 = arith.constant 0 : index
    %c0_7 = arith.constant 0 : index
    %8 = vector.load %arg2[%c0_6, %c0_7] : memref<16x128xf32, #tpu.memory_space<vmem>>, vector<16x128xf32>
    %cst_8 = arith.constant dense<0.000000e+00> : vector<16x128xf32>
    %9 = tpu.matmul %0, %8, %cst_8 {dimension_numbers = #tpu.dot_dimension_numbers<[1], [0], [0], [1], [0, 0, 1, 1], [], []>} : vector<16x16xf32>, vector<16x128xf32>, vector<16x128xf32> -> vector<16x128xf32>
    %c0_9 = arith.constant 0 : index
    %c0_10 = arith.constant 0 : index
    %10 = vector.load %arg4[%c0_9, %c0_10] : memref<128x128xf32, #tpu.memory_space<vmem>>, vector<128x128xf32>
    %cst_11 = arith.constant dense<0.000000e+00> : vector<16x128xf32>
    %11 = tpu.matmul %7, %10, %cst_11 {dimension_numbers = #tpu.dot_dimension_numbers<[1], [0], [0], [1], [0, 0, 1, 1], [], []>} : vector<16x128xf32>, vector<128x128xf32>, vector<16x128xf32> -> vector<16x128xf32>
    %12 = arith.addf %9, %11 : vector<16x128xf32>
    %c1 = arith.constant 1 : index
    %c0_12 = arith.constant 0 : index
    %13 = vector.load %arg5[%c1, %c0_12] : memref<2x128xf32, #tpu.memory_space<vmem>>, vector<1x128xf32>
    %14 = vector.broadcast %13 : vector<1x128xf32> to vector<16x128xf32>
    %15 = arith.addf %12, %14 : vector<16x128xf32>
    %cst_13 = arith.constant 0.000000e+00 : f32
    %16 = vector.broadcast %cst_13 : f32 to vector<16x128xf32>
    %17 = arith.maximumf %15, %16 : vector<16x128xf32>
    %c0_14 = arith.constant 0 : index
    %c0_15 = arith.constant 0 : index
    %18 = vector.load %arg6[%c0_14, %c0_15] : memref<16x128xf32, #tpu.memory_space<vmem>>, vector<16x128xf32>
    tpu.vector_store %arg6[%c0_14, %c0_15], %17 {strides = array<i32>} : memref<16x128xf32, #tpu.memory_space<vmem>>, vector<16x128xf32>,
    return
  }
  func.func @transform_0(%arg0: i32) -> (i32, i32) {
    %c0_i32 = arith.constant 0 : i32
    %c0_i32_0 = arith.constant 0 : i32
    return %arg0, %c0_i32 : i32, i32
  }
  func.func @transform_1(%arg0: i32) -> (i32, i32) {
    %c0_i32 = arith.constant 0 : i32
    %c0_i32_0 = arith.constant 0 : i32
    %c0_i32_1 = arith.constant 0 : i32
    return %c0_i32, %c0_i32_0 : i32, i32
  }
  func.func @transform_2(%arg0: i32) -> (i32, i32) {
    %c0_i32 = arith.constant 0 : i32
    %c0_i32_0 = arith.constant 0 : i32
    %c0_i32_1 = arith.constant 0 : i32
    return %c0_i32, %c0_i32_0 : i32, i32
  }
  func.func @transform_3(%arg0: i32) -> (i32, i32) {
    %c0_i32 = arith.constant 0 : i32
    %c0_i32_0 = arith.constant 0 : i32
    %c0_i32_1 = arith.constant 0 : i32
    return %c0_i32, %c0_i32_0 : i32, i32
  }
  func.func @transform_4(%arg0: i32) -> (i32, i32) {
    %c0_i32 = arith.constant 0 : i32
    %c0_i32_0 = arith.constant 0 : i32
    %c0_i32_1 = arith.constant 0 : i32
    return %c0_i32, %c0_i32_0 : i32, i32
  }
  func.func @transform_5(%arg0: i32) -> (i32, i32) {
    %c0_i32 = arith.constant 0 : i32
    %c0_i32_0 = arith.constant 0 : i32
    return %arg0, %c0_i32 : i32, i32
  }
}

</mosaic_0001>

<bundles_post_ra>
// kernel: tpu_custom_call.1
= control target key start
LH: loop header
LB: loop body
LE: loop exit
PB: predicated region body
PF: predicated region fallthrough
CT: control target
= control target key end

     0   :  { %10 = vsyncpa [#allocation3], 0  ;;  %s449_s0 = inlined_call_operand.hbm [shape: f32[16,16], index: 0, kind: input, shape index: {}]   ;;  %s450_s1 = inlined_call_operand.hbm [shape: f32[16,128], index: 1, kind: input, shape index: {}]   ;;  %s451_s2 = inlined_call_operand.hbm [shape: f32[16,128], index: 2, kind: input, shape index: {}]   ;;  %s452_s3 = inlined_call_operand.hbm [shape: f32[128,128], index: 3, kind: input, shape index: {}]   ;;  %s453_s4 = inlined_call_operand.vmem [shape: f32[2,128], index: 4, kind: input, shape index: {}]   ;;  %s454_s5 = inlined_call_operand.hbm [shape: f32[16,128], index: 5, kind: output, shape index: {}]  }
   0x1   :  { %11 = vsyncpa [#allocation6], 0 }
   0x2   :  { %12 = vsyncpa [#allocation9], 0 }
   0x3   :  { %13 = vsyncpa [#allocation4], 0  ;;  %s31_s20 = sshll.u32 %s450_s1, 4  ;;  %s372_s21 = smov [#allocation5]   ;;  %s32_s20 = int_to_ptr.hbm [resolvable:$true] %s31_s20 }
   0x4   :  { %s33_s22 = sshll.u32 %s372_s21, 4  ;;  %s18_s25 = sshll.u32 %s449_s0, 4  ;;  %s34_s22 = int_to_ptr.vmem [resolvable:$true] %s33_s22  ;;  %s19_s25 = int_to_ptr.hbm [resolvable:$true] %s18_s25 }
   0x5   :  { %s373_s26 = smov 128   ;;  %s374_s27 = smov 8  }
   0x6   :  { %39 = dma.hbm_to_vmem [thread:$0]  %s32_s20, 256, %s34_s22, [#allocation6], %s373_s26, %s373_s26, %s374_s27  }
   0x7   :  { %s375_s28 = smov [#allocation2]   ;;  %s44_s1 = sshll.u32 %s451_s2, 4  ;;  %s45_s1 = int_to_ptr.hbm [resolvable:$true] %s44_s1 }
   0x8   :  { %s20_s29 = sshll.u32 %s375_s28, 4  ;;  %s57_s8 = sshll.u32 %s452_s3, 4  ;;  %s21_s29 = int_to_ptr.vmem [resolvable:$true] %s20_s29  ;;  %s58_s8 = int_to_ptr.hbm [resolvable:$true] %s57_s8 }
   0x9   :  { %26 = dma.hbm_to_vmem [thread:$0]  %s19_s25, 256, %s21_s29, [#allocation3], %s373_s26, %s373_s26, %s374_s27  }
   0xa   :  { %s376_s9 = smov [#allocation7]   ;;  %s377_s11 = smov [#allocation8]  }
   0xb   :  { %s46_s10 = sshll.u32 %s376_s9, 4  ;;  %s59_s2 = sshll.u32 %s377_s11, 4  ;;  %s47_s10 = int_to_ptr.vmem [resolvable:$true] %s46_s10  ;;  %s60_s2 = int_to_ptr.vmem [resolvable:$true] %s59_s2 }
   0xc   :  { %52 = dma.hbm_to_vmem [thread:$0]  %s45_s1, 256, %s47_s10, [#allocation6], %s373_s26, %s373_s26, %s374_s27  }
   0xd   :  { %65 = dma.hbm_to_vmem [thread:$0]  %s58_s8, 2048, %s60_s2, [#allocation9], %s373_s26, %s373_s26, %s374_s27  }
   0xe   :  { %364 = dma.done.wait [#allocation3], 256  }
   0xf   :  { %365 = vsyncadd [#allocation3], 4294967040 }
  0x10   :  { %366 = dma.done.wait [#allocation6], 512  }
  0x11   :  { %367 = vsyncadd [#allocation6], 4294966784 }
  0x12   :  { %368 = dma.done.wait [#allocation9], 2048  }
  0x13   :  { %369 = vsyncadd [#allocation9], 4294965248  ;;  %v87_v0 = vld [vmem:[#allocation7 + $0x8] sm:$0xff]  ;;  %v86_v1 = vld [vmem:[#allocation7] sm:$0xff]  ;;  %vm90_vm0 = vcmask 130048   ;;  %s378_s15 = smov [#allocation10]  }
  0x14   :  { %111 = vmatpush.msra.mxu0 %v87_v0  ;;  %v84_v2 = vld [vmem:[#allocation2] sm:$0xff]  ;;  %v139_v3 = vld [vmem:[#allocation8 + $0x78] sm:$0xff]  ;;  %v137_v5 = vld [vmem:[#allocation8 + $0x68] sm:$0xff]  ;;  %s198_s16 = sshll.u32 %s378_s15, 4  ;;  %s200_s19 = sshll.u32 %s454_s5, 4  ;;  %s199_s16 = int_to_ptr.vmem [resolvable:$true] %s198_s16  ;;  %s201_s19 = int_to_ptr.hbm [resolvable:$true] %s200_s19 }
  0x15   :  { %v138_v4 = vld [vmem:[#allocation8 + $0x70] sm:$0xff]  ;;  %140 = vmatpush.msra.mxu1 %v139_v3  ;;  %219 = vmatpush.msra.mxu3 %v139_v3  ;;  %v136_v6 = vld [vmem:[#allocation8 + $0x60] sm:$0xff]  ;;  %v123_v7 = vld [vmem:[#allocation5 + $0x8] sm:$0xff] }
  0x16   :  { %112 = vmatpush.msra.mxu0 %v86_v1  ;;  %177 = vmatpush.msra.mxu2 %v123_v7  ;;  %v122_v8 = vld [vmem:[#allocation5] sm:$0xff]  ;;  %v135_v9 = vld [vmem:[#allocation8 + $0x58] sm:$0xff]  ;;  %v134_v11 = vld [vmem:[#allocation8 + $0x50] sm:$0xff] }
  0x17   :  { %215 = vmatmul.msk.f32.vlgmr.msra.gmra.mxu0 %vm90_vm0, %v84_v2  ;;  %141 = vmatpush.msra.mxu1 %v138_v4  ;;  %v85_v10 = vld [vmem:[#allocation2 + $0x8] sm:$0xff]  ;;  %v133_v12 = vld [vmem:[#allocation8 + $0x48] sm:$0xff]  ;;  %v132_v13 = vld [vmem:[#allocation8 + $0x40] sm:$0xff] }
  0x18   :  { %220 = vmatpush.msra.mxu3 %v138_v4  ;;  %178 = vmatpush.msra.mxu2 %v122_v8  ;;  %v131_v14 = vld [vmem:[#allocation8 + $0x38] sm:$0xff]  ;;  %v130_v15 = vld [vmem:[#allocation8 + $0x30] sm:$0xff]  ;;  %v129_v16 = vld [vmem:[#allocation8 + $0x28] sm:$0xff] }
  0x19   :  { %142 = vmatpush.msra.mxu1 %v137_v5  ;;  %217 = vmatmul.msk.f32.vlgmr.msra.gmra.mxu2 %vm90_vm0, %v84_v2  ;;  %v128_v17 = vld [vmem:[#allocation8 + $0x20] sm:$0xff]  ;;  %v127_v18 = vld [vmem:[#allocation8 + $0x18] sm:$0xff]  ;;  %v126_v19 = vld [vmem:[#allocation8 + $0x10] sm:$0xff] }
  0x1a   :  { %221 = vmatpush.msra.mxu3 %v137_v5  ;;  %v125_v20 = vld [vmem:[#allocation8 + $0x8] sm:$0xff]  ;;  %v124_v21 = vld [vmem:[#allocation8] sm:$0xff]  ;;  %v242_v22 = vld [vmem:[%s453_s4] ss:$0 sm:$0xff] }
  0x1b   :  { %143 = vmatpush.msra.mxu1 %v136_v6  ;;  %v243_v30 = vld [vmem:[%s453_s4 + $0x1] ss:$0 sm:$0xff] }
  0x1c   :  { %222 = vmatpush.msra.mxu3 %v136_v6 }
  0x1d   :  { %144 = vmatpush.msra.mxu1 %v135_v9 }
  0x1e   :  { %223 = vmatpush.msra.mxu3 %v135_v9 }
  0x1f   :  { %216 = vmatmul.msk.f32.gmra.mxu0 %vm90_vm0, %v85_v10  ;;  %145 = vmatpush.msra.mxu1 %v134_v11 }
  0x20   :  { %224 = vmatpush.msra.mxu3 %v134_v11 }
  0x21   :  { %146 = vmatpush.msra.mxu1 %v133_v12  ;;  %218 = vmatmul.msk.f32.gmra.mxu2 %vm90_vm0, %v85_v10 }
  0x22   :  { %225 = vmatpush.msra.mxu3 %v133_v12 }
  0x23   :  { %147 = vmatpush.msra.mxu1 %v132_v13 }
  0x24   :  { %226 = vmatpush.msra.mxu3 %v132_v13 }
  0x25   :  { %148 = vmatpush.msra.mxu1 %v131_v14 }
  0x26   :  { %227 = vmatpush.msra.mxu3 %v131_v14 }
  0x27   :  { %149 = vmatpush.msra.mxu1 %v130_v15 }
  0x28   :  { %228 = vmatpush.msra.mxu3 %v130_v15 }
  0x29   :  { %150 = vmatpush.msra.mxu1 %v129_v16 }
  0x2a   :  { %229 = vmatpush.msra.mxu3 %v129_v16 }
  0x2b   :  { %151 = vmatpush.msra.mxu1 %v128_v17 }
  0x2c   :  { %230 = vmatpush.msra.mxu3 %v128_v17 }
  0x2d   :  { %152 = vmatpush.msra.mxu1 %v127_v18 }
  0x2e   :  { %231 = vmatpush.msra.mxu3 %v127_v18 }
  0x2f   :  { %153 = vmatpush.msra.mxu1 %v126_v19 }
  0x30   :  { %232 = vmatpush.msra.mxu3 %v126_v19 }
  0x31   :  { %154 = vmatpush.msra.mxu1 %v125_v20 }
  0x32   :  { %233 = vmatpush.msra.mxu3 %v125_v20 }
  0x33   :  { %155 = vmatpush.msra.mxu1 %v124_v21 }
  0x34   :  { %234 = vmatpush.msra.mxu3 %v124_v21 }
  0x94   :  { %v114_v23 = vpop.f32.mrf.mxu0 }
  0x95   :  { %v115_v24 = vadd.f32 %v242_v22, %v114_v23 }
  0x97   :  { %v120_v25 = vmax.f32 %v115_v24, 0.0 }
  0x99   :  { %156 = vmatmul.f32.vlgmr.msra.gmra.mxu1 %v120_v25 }
  0x9c   :  { %v117_v26 = vpop.f32.mrf.mxu0  ;;  %v180_v29 = vpop.f32.mrf.mxu2 }
  0x9d   :  { %v118_v27 = vadd.f32 %v242_v22, %v117_v26 }
  0x9f   :  { %v121_v28 = vmax.f32 %v118_v27, 0.0 }
  0xa1   :  { %159 = vmatmul.f32.vlgmr.msra.gmra.mxu3 %v121_v28 }
  0xa4   :  { %v183_v35 = vpop.f32.mrf.mxu2 }
 0x116   :  { %v157_v31 = vpop.f32.mrf.mxu1 }
 0x117   :  { %v181_v32 = vadd.f32 %v180_v29, %v157_v31 }
 0x119   :  { %v188_v33 = vadd.f32 %v243_v30, %v181_v32 }
 0x11b   :  { %v190_v34 = vmax.f32 %v188_v33, 0.0 }
 0x11d   :  { %192 = vst [vmem:[#allocation10] sm:$0xff] %v190_v34 }
 0x124   :  { %v160_v36 = vpop.f32.mrf.mxu3 }
 0x125   :  { %v184_v37 = vadd.f32 %v183_v35, %v160_v36 }
 0x127   :  { %v189_v38 = vadd.f32 %v243_v30, %v184_v37 }
 0x129   :  { %v191_v39 = vmax.f32 %v189_v38, 0.0 }
 0x12b   :  { %193 = vst [vmem:[#allocation10 + $0x8] sm:$0xff] %v191_v39 }
 0x12c   :  { %206 = dma.vmem_to_hbm [thread:$0]  %s199_s16, 256, %s201_s19, [#allocation4], %s373_s26, %s373_s26, %s374_s27  }
 0x12d   :  { %370 = dma.done.wait [#allocation4], 256  }
 0x12e   :  { %371 = vsyncadd [#allocation4], 4294967040 }
 0x12f   :  { %211 = vsyncpa [#allocation3], 1 }
 0x130   :  { %212 = vsyncpa [#allocation6], 1 }
 0x131   :  { %213 = vsyncpa [#allocation9], 1 }
 0x132   :  { %214 = vsyncpa [#allocation4], 1 }

</bundles_post_ra>
